<compile_context>
chip_gen: v6e
topology: v6e:2x2x1
jax: 0.10.0
libtpu: 0.0.40
codegen_flags: <defaults>
</compile_context>

<pallas_src>
import functools
import math

import jax
import jax.numpy as jnp
from jax.experimental import pallas as pl
from jax.experimental.pallas import tpu as pltpu


# ---------------------------------------------------------------------------
# Helpers
# ---------------------------------------------------------------------------
def _round_up(x, m):
    return ((x + m - 1) // m) * m


def _apply_act(name, x):
    if name == "sigmoid":
        return jax.nn.sigmoid(x)
    if name == "tanh":
        return jnp.tanh(x)
    if name == "relu":
        return jnp.maximum(x, 0.0)
    if name is None or name == "linear":
        return x
    raise ValueError(f"unsupported activation: {name}")


def _vmem_capacity_bytes():
    """Physical VMEM of the attached chip; conservative fallback = v7x (64 MiB)."""
    try:
        cap = getattr(pltpu.get_tpu_info(), "vmem_capacity_bytes", None)
        if cap:
            return int(cap)
    except Exception:
        pass
    return 64 * 1024 * 1024


# ---------------------------------------------------------------------------
# Kernel
# ---------------------------------------------------------------------------
def _packed_gates_kernel(*refs, n_inputs, indims, act_segments, use_bias):
    x_refs = refs[:n_inputs]
    w_ref = refs[n_inputs]        # (sum(indims), outdim_p) bf16, grid-resident
    b_ref = refs[n_inputs + 1]    # (1, outdim_p) f32, grid-resident
    o_ref = refs[n_inputs + 2]    # (bm, outdim_p) bf16

    # Fused "concat + matmul": per-input dots against row slices of the single
    # packed weight, summed into one f32 accumulator.  Inputs arrive as f32
    # (no wrapper-side cast/pad HBM passes); the bf16 cast is VPU work hidden
    # under the DMA/MXU.
    # TODO(synk): for small per-input K (<256) on v6e/v7x, fuse the LHS tiles
    # with an in-kernel minor-dim concat so all inputs share one MXU pass.
    v = None
    off = 0
    for xr, d in zip(x_refs, indims):
        t = jnp.dot(xr[...].astype(jnp.bfloat16), w_ref[off:off + d, :],
                    preferred_element_type=jnp.float32)
        v = t if v is None else v + t
        off += d
    if use_bias:
        v = v + b_ref[...]  # (1, Np) f32 broadcast over rows

    # Per-activation 128-lane-aligned column segments (gates were re-packed so
    # each activation owns whole vreg tiles): each activation runs only over
    # its own lanes, and every store is lane-dense (no masks, no selects).
    for act, s, e in act_segments:
        o_ref[:, s:e] = _apply_act(act, v[:, s:e]).astype(o_ref.dtype)


# ---------------------------------------------------------------------------
# PackedRNUGates equivalent (the wrapped block)
# ---------------------------------------------------------------------------
class PackedRNUGatesPallas:
    """Takes len(indims) inputs of shape (M, indims[i]); returns one (M, gdim)
    bf16 tensor per gate spec (rec_bn=False path)."""

    def __init__(self, indims, outgatespecs, use_bias=True, key=None,
                 return_packed=False):
        assert len(outgatespecs) >= 1
        self.indims = tuple(int(d) for d in indims)
        self.indim_total = sum(self.indims)
        self.use_bias = use_bias
        self.return_packed = return_packed

        # Original (module-order) gate column ranges.
        self.outgates_orig = []
        off = 0
        for gdim, gact in outgatespecs:
            self.outgates_orig.append(((off, off + gdim), gact))
            off += gdim
        self.outdim = off

        # Re-pack gates: same-activation gates contiguous, every activation
        # group 128-lane aligned.  Pad columns carry zero weights/bias and are
        # never read back (trimmed by the per-gate slices).
        groups, order = {}, []
        for gi, ((s, e), act) in enumerate(self.outgates_orig):
            if act not in groups:
                groups[act] = []
                order.append(act)
            groups[act].append((gi, s, e))
        self.gate_packed_ranges = [None] * len(self.outgates_orig)
        act_segments = []
        pstart = 0
        for act in order:
            cursor = pstart
            for gi, s, e in groups[act]:
                self.gate_packed_ranges[gi] = (cursor, cursor + (e - s))
                cursor += e - s
            pend = _round_up(cursor, 128)
            act_segments.append((act, pstart, pend))
            pstart = pend
        self.act_segments = tuple(act_segments)
        self.outdim_p = pstart  # multiple of 128 -> lane-dense stores

        # --- parameters -----------------------------------------------------
        if key is None:
            key = jax.random.PRNGKey(0)
        kw, kb = jax.random.split(key)
        bound = math.sqrt(6.0 / (self.indim_total + self.outdim))  # xavier_uniform
        self.W_orig = jax.random.uniform(kw, (self.indim_total, self.outdim),
                                         jnp.float32, minval=-bound, maxval=bound)
        if use_bias:
            self.b_orig = jax.random.uniform(kb, (1, self.outdim), jnp.float32,
                                             minval=-0.01, maxval=0.01)
        else:
            self.b_orig = jnp.zeros((1, self.outdim), jnp.float32)

        # Packed / padded kernel-side parameters (bf16 weights, f32 bias).
        W_p = jnp.zeros((self.indim_total, self.outdim_p), jnp.float32)
        b_p = jnp.zeros((1, self.outdim_p), jnp.float32)
        for gi, ((s, e), _) in enumerate(self.outgates_orig):
            ps, pe = self.gate_packed_ranges[gi]
            W_p = W_p.at[:, ps:pe].set(self.W_orig[:, s:e])
            b_p = b_p.at[:, ps:pe].set(self.b_orig[:, s:e])
        self.W_packed = W_p.astype(jnp.bfloat16)  # documented bf16 precision choice
        self.b_packed = b_p

        # --- VMEM budgeting ---------------------------------------------------
        cap = _vmem_capacity_bytes()          # 64 MiB v7x, 128 MiB v5e/v6e
        self._tile_budget = cap // 2          # working-set target for tile sizing
        self._vmem_limit = min(int(cap * 0.75), 96 * 1024 * 1024)
        # TODO(synk): on v7x, single-buffer the constant weight/bias specs
        # (pipeline_mode=pl.Buffered(1)); the budget below conservatively counts
        # them double-buffered instead.
        # TODO(synk): rec_bn=True (SeqBatchNorm1d) branch not implemented.

    def _pick_bm(self, m):
        # Largest row tile that fits the VMEM budget (review: per-grid-step
        # overhead ~0.35 us; 128-row tiles leave a mem-bound kernel at ~30% of
        # HBM roofline vs ~85% at 512+).
        per_row = 2 * self.indim_total * 4 + 2 * self.outdim_p * 2   # f32 in + bf16 out, dbl-buffered
        resident = 2 * (self.indim_total * self.outdim_p * 2 + self.outdim_p * 4)
        avail = max(self._tile_budget - resident, per_row * 128)
        bm_cap = min(2048, max(128, (avail // per_row) // 128 * 128))
        if m > bm_cap:
            return bm_cap                                   # many "parallel" steps
        if m >= 1024:
            # Fits in one tile but is big: keep 2 steps so v7x's 2 TensorCores
            # both get work (cheap to amortize at this size).
            return min(bm_cap, _round_up(-(-m // 2), 128))
        return max(16, _round_up(m, 16))                    # tiny M: one grid step

    def __call__(self, *args):
        assert len(args) == len(self.indims)
        m = args[0].shape[0]
        for a, d in zip(args, self.indims):
            assert a.shape == (m, d)
        bm = self._pick_bm(m)
        n_in = len(self.indims)

        kernel = functools.partial(
            _packed_gates_kernel,
            n_inputs=n_in, indims=self.indims,
            act_segments=self.act_segments, use_bias=self.use_bias)

        in_specs = (
            [pl.BlockSpec((bm, d), lambda i: (i, 0)) for d in self.indims]
            + [pl.BlockSpec((self.indim_total, self.outdim_p), lambda i: (0, 0)),
               pl.BlockSpec((1, self.outdim_p), lambda i: (0, 0))]
        )
        packed = pl.pallas_call(
            kernel,
            out_shape=jax.ShapeDtypeStruct((m, self.outdim_p), jnp.bfloat16),
            grid_spec=pltpu.PrefetchScalarGridSpec(
                num_scalar_prefetch=0,
                grid=(pl.cdiv(m, bm),),
                in_specs=in_specs,
                out_specs=pl.BlockSpec((bm, self.outdim_p), lambda i: (i, 0)),
            ),
            compiler_params=pltpu.CompilerParams(
                dimension_semantics=("parallel",),
                vmem_limit_bytes=self._vmem_limit,
            ),
        )(*args, self.W_packed, self.b_packed)

        if self.return_packed:
            return packed  # let the consumer slice lazily (cheapest for large M)
        # TODO(synk): when every gate width is a 128 multiple, emit one
        # lane-dense out_spec per gate instead of slicing the packed array here.
        ret = tuple(packed[:, ps:pe] for ps, pe in self.gate_packed_ranges)
        return ret[0] if len(ret) == 1 else ret


# ---------------------------------------------------------------------------
# RecurrentWrapper equivalent
# ---------------------------------------------------------------------------
class RecurrentWrapperPallas:
    """qelos RecurrentWrapper: fold (B, T) into the batch axis, run the block
    once over all B*T rows, unfold outputs back to (B, T, ...)."""

    def __init__(self, block):
        self.block = block

    def __call__(self, *x):
        x0 = x[0]
        B, T = x0.shape[0], x0.shape[1]
        flat = [xe.reshape((B * T,) + xe.shape[2:]) for xe in x]
        y = self.block(*flat)
        if not isinstance(y, (tuple, list)):
            y = (y,)
        yo = tuple(ye.reshape((B, T) + ye.shape[1:]) for ye in y)
        return yo[0] if len(yo) == 1 else yo


# ---------------------------------------------------------------------------
# Pure-JAX references for verification
# ---------------------------------------------------------------------------
def reference_bf16(block, *flat_args):
    """Matches kernel numerics: bf16 inputs/weights, f32 accumulate, bf16 store."""
    x = jnp.concatenate([a.astype(jnp.bfloat16) for a in flat_args], axis=1)
    v = jnp.dot(x, block.W_orig.astype(jnp.bfloat16),
                preferred_element_type=jnp.float32)
    if block.use_bias:
        v = v + block.b_orig
    return tuple(_apply_act(act, v[:, s:e]).astype(jnp.bfloat16)
                 for (s, e), act in block.outgates_orig)


def reference_f32(block, *flat_args):
    """Original-module numerics (f32 concat-matmul)."""
    x = jnp.concatenate(list(flat_args), axis=1)
    v = x @ block.W_orig
    if block.use_bias:
        v = v + block.b_orig
    return tuple(_apply_act(act, v[:, s:e]) for (s, e), act in block.outgates_orig)


if __name__ == "__main__":
    key = jax.random.PRNGKey(0)
    k_inp, k_h, k_param = jax.random.split(key, 3)

    B, T, D, H = 4, 16, 16, 32  # batch, seq, input dim, hidden dim
    gate_specs = [(H, "sigmoid"), (H, "sigmoid"), (H, "tanh")]  # GRU-style gates

    block = PackedRNUGatesPallas((D, H), gate_specs, use_bias=True, key=k_param)
    wrapper = RecurrentWrapperPallas(block)

    inp = jax.random.normal(k_inp, (B, T, D), jnp.float32)
    h_prev = jax.random.normal(k_h, (B, T, H), jnp.float32)

    out = wrapper(inp, h_prev)
    out = jax.block_until_ready(out)

    # Correctness vs references on the flattened rows.
    flat = (inp.reshape(B * T, D), h_prev.reshape(B * T, H))
    ref16 = reference_bf16(block, *flat)
    ref32 = reference_f32(block, *flat)
    for j, (o, r16, r32) in enumerate(zip(out, ref16, ref32)):
        gdim = gate_specs[j][0]
        assert o.shape == (B, T, gdim)
        assert o.dtype == jnp.bfloat16
        o_flat = o.reshape(B * T, gdim).astype(jnp.float32)
        err16 = float(jnp.max(jnp.abs(o_flat - r16.astype(jnp.float32))))
        err32 = float(jnp.max(jnp.abs(o_flat - r32)))
        assert err16 < 8e-3, f"gate {j}: mismatch vs bf16 reference ({err16})"
        assert err32 < 5e-2, f"gate {j}: mismatch vs f32 reference ({err32})"

    print("KERNEL_OK")
</pallas_src>

<mosaic_0001>
module attributes {stable_mosaic.version = 11 : i64} {
  func.func @_packed_gates_kernel(%arg0: i32, %arg1: memref<64x16xf32, #tpu.memory_space<vmem>>, %arg2: memref<64x32xf32, #tpu.memory_space<vmem>>, %arg3: memref<48x256xbf16, #tpu.memory_space<vmem>>, %arg4: memref<1x256xf32, #tpu.memory_space<vmem>>, %arg5: memref<64x256xbf16, #tpu.memory_space<vmem>>) attributes {dimension_semantics = [#tpu.dimension_semantics<parallel>], iteration_bounds = array<i64: 1>, scalar_prefetch = 0 : i64, scratch_operands = 0 : i64, tpu.core_type = #tpu.core_type<tc>, window_params = [{transform_indices = @transform_0, window_bounds = array<i64: 64, 16>}, {transform_indices = @transform_1, window_bounds = array<i64: 64, 32>}, {pipeline_mode = #tpu.pipeline_mode<synchronous>, transform_indices = @transform_2, window_bounds = array<i64: 48, 256>}, {pipeline_mode = #tpu.pipeline_mode<synchronous>, transform_indices = @transform_3, window_bounds = array<i64: 1, 256>}, {transform_indices = @transform_4, window_bounds = array<i64: 64, 256>}]} {
    %c0 = arith.constant 0 : index
    %c0_0 = arith.constant 0 : index
    %0 = vector.load %arg1[%c0, %c0_0] : memref<64x16xf32, #tpu.memory_space<vmem>>, vector<64x16xf32>
    %1 = arith.truncf %0 : vector<64x16xf32> to vector<64x16xbf16>
    %c0_1 = arith.constant 0 : index
    %c0_2 = arith.constant 0 : index
    %2 = vector.load %arg3[%c0_1, %c0_2] : memref<48x256xbf16, #tpu.memory_space<vmem>>, vector<16x256xbf16>
    %cst = arith.constant dense<0.000000e+00> : vector<64x256xf32>
    %3 = tpu.matmul %1, %2, %cst {dimension_numbers = #tpu.dot_dimension_numbers<[1], [0], [0], [1], [0, 0, 1, 1], [], []>} : vector<64x16xbf16>, vector<16x256xbf16>, vector<64x256xf32> -> vector<64x256xf32>
    %c0_3 = arith.constant 0 : index
    %c0_4 = arith.constant 0 : index
    %4 = vector.load %arg2[%c0_3, %c0_4] : memref<64x32xf32, #tpu.memory_space<vmem>>, vector<64x32xf32>
    %5 = arith.truncf %4 : vector<64x32xf32> to vector<64x32xbf16>
    %c16 = arith.constant 16 : index
    %c0_5 = arith.constant 0 : index
    %6 = vector.load %arg3[%c16, %c0_5] : memref<48x256xbf16, #tpu.memory_space<vmem>>, vector<32x256xbf16>
    %cst_6 = arith.constant dense<0.000000e+00> : vector<64x256xf32>
    %7 = tpu.matmul %5, %6, %cst_6 {dimension_numbers = #tpu.dot_dimension_numbers<[1], [0], [0], [1], [0, 0, 1, 1], [], []>} : vector<64x32xbf16>, vector<32x256xbf16>, vector<64x256xf32> -> vector<64x256xf32>
    %8 = arith.addf %3, %7 : vector<64x256xf32>
    %c0_7 = arith.constant 0 : index
    %c0_8 = arith.constant 0 : index
    %9 = vector.load %arg4[%c0_7, %c0_8] : memref<1x256xf32, #tpu.memory_space<vmem>>, vector<1x256xf32>
    %10 = vector.broadcast %9 : vector<1x256xf32> to vector<64x256xf32>
    %11 = arith.addf %8, %10 : vector<64x256xf32>
    %12 = vector.extract_strided_slice %11 {offsets = [0, 0], sizes = [64, 128], strides = [1, 1]} : vector<64x256xf32> to vector<64x128xf32>
    %13 = arith.negf %12 : vector<64x128xf32>
    %14 = math.exp %13 : vector<64x128xf32>
    %cst_9 = arith.constant 1.000000e+00 : f32
    %15 = vector.broadcast %cst_9 : f32 to vector<64x128xf32>
    %16 = arith.addf %15, %14 : vector<64x128xf32>
    %17 = arith.divf %15, %16 : vector<64x128xf32>
    %18 = arith.truncf %17 : vector<64x128xf32> to vector<64x128xbf16>
    %c0_10 = arith.constant 0 : index
    %c0_11 = arith.constant 0 : index
    %19 = vector.load %arg5[%c0_10, %c0_11] : memref<64x256xbf16, #tpu.memory_space<vmem>>, vector<64x128xbf16>
    tpu.vector_store %arg5[%c0_10, %c0_11], %18 {strides = array<i32>} : memref<64x256xbf16, #tpu.memory_space<vmem>>, vector<64x128xbf16>,
    %20 = vector.extract_strided_slice %11 {offsets = [0, 128], sizes = [64, 128], strides = [1, 1]} : vector<64x256xf32> to vector<64x128xf32>
    %21 = math.tanh %20 : vector<64x128xf32>
    %22 = arith.truncf %21 : vector<64x128xf32> to vector<64x128xbf16>
    %c0_12 = arith.constant 0 : index
    %c128 = arith.constant 128 : index
    %23 = vector.load %arg5[%c0_12, %c128] : memref<64x256xbf16, #tpu.memory_space<vmem>>, vector<64x128xbf16>
    tpu.vector_store %arg5[%c0_12, %c128], %22 {strides = array<i32>} : memref<64x256xbf16, #tpu.memory_space<vmem>>, vector<64x128xbf16>,
    return
  }
  func.func @transform_0(%arg0: i32) -> (i32, i32) {
    %c0_i32 = arith.constant 0 : i32
    %c0_i32_0 = arith.constant 0 : i32
    return %arg0, %c0_i32 : i32, i32
  }
  func.func @transform_1(%arg0: i32) -> (i32, i32) {
    %c0_i32 = arith.constant 0 : i32
    %c0_i32_0 = arith.constant 0 : i32
    return %arg0, %c0_i32 : i32, i32
  }
  func.func @transform_2(%arg0: i32) -> (i32, i32) {
    %c0_i32 = arith.constant 0 : i32
    %c0_i32_0 = arith.constant 0 : i32
    %c0_i32_1 = arith.constant 0 : i32
    return %c0_i32, %c0_i32_0 : i32, i32
  }
  func.func @transform_3(%arg0: i32) -> (i32, i32) {
    %c0_i32 = arith.constant 0 : i32
    %c0_i32_0 = arith.constant 0 : i32
    %c0_i32_1 = arith.constant 0 : i32
    return %c0_i32, %c0_i32_0 : i32, i32
  }
  func.func @transform_4(%arg0: i32) -> (i32, i32) {
    %c0_i32 = arith.constant 0 : i32
    %c0_i32_0 = arith.constant 0 : i32
    return %arg0, %c0_i32 : i32, i32
  }
}

</mosaic_0001>

<bundles_post_ra>
// kernel: tpu_custom_call.1
= control target key start
LH: loop header
LB: loop body
LE: loop exit
PB: predicated region body
PF: predicated region fallthrough
CT: control target
= control target key end

     0   :  { %v568_v2 = vmov 0   ;;  %vm165_vm0 = vcmask 130048   ;;  %vm69_vm1 = vcmask 261120   ;;  %s697_s0 = inlined_call_operand.vmem [shape: f32[64,16], index: 0, kind: input, shape index: {}]   ;;  %s698_s1 = inlined_call_operand.vmem [shape: f32[64,32], index: 1, kind: input, shape index: {}]   ;;  %s699_s2 = inlined_call_operand.vmem [shape: bf16[48,256], index: 2, kind: input, shape index: {}]   ;;  %s700_s3 = inlined_call_operand.vmem [shape: f32[1,256], index: 3, kind: input, shape index: {}]   ;;  %s701_s4 = inlined_call_operand.hbm [shape: bf16[64,256], index: 4, kind: output, shape index: {}]  }
   0x1   :  { %v489_v0 = vld [vmem:[%s699_s2 + $0x24] ss:$8 sps:$4 sm:$0xff]   ;;  %210 = vmatprep.mubr.bf16.mxu1 %v568_v2  ;;  %114 = vmatprep.mubr.bf16.mxu0 %v568_v2  ;;  %v493_v3 = vld [vmem:[%s699_s2 + $0x20] ss:$8 sps:$4 sm:$0xff]   ;;  %v495_v5 = vld [vmem:[%s699_s2 + $0x14] ss:$8 sps:$4 sm:$0xff]  }
   0x2   :  { %v491_v1 = vld [vmem:[%s699_s2 + $0x4] ss:$8 sps:$4 sm:$0xff]   ;;  %94 = vmatprep.subr.bf16.mxu0 %v489_v0  ;;  %v494_v4 = vld [vmem:[%s699_s2] ss:$8 sps:$4 sm:$0xff]   ;;  %v497_v8 = vld [vmem:[%s699_s2 + $0x10] ss:$8 sps:$4 sm:$0xff]  }
   0x3   :  { %192 = vmatprep.subr.bf16.mxu1 %v491_v1  ;;  %v19_v6 = vld [vmem:[%s697_s0] sm:$0xff]  ;;  %95 = vmatpush1.bf16.msra.mxu0 %v493_v3  ;;  %v20_v7 = vld [vmem:[%s697_s0 + $0x8] sm:$0xff]  ;;  %v21_v13 = vld [vmem:[%s697_s0 + $0x10] sm:$0xff] }
   0x4   :  { %193 = vmatpush1.bf16.msra.mxu1 %v494_v4  ;;  %v33_v9 = vld [vmem:[%s698_s1] sm:$0xff]  ;;  %96 = vmatprep.subr.bf16.mxu0 %v495_v5  ;;  %v27_v10 = vpack.c.bf16 %v20_v7, %v19_v6  ;;  %v34_v11 = vld [vmem:[%s698_s1 + $0x8] sm:$0xff]  ;;  %v22_v14 = vld [vmem:[%s697_s0 + $0x18] sm:$0xff] }
   0x5   :  { %v41_v12 = vpack.c.bf16 %v34_v11, %v33_v9 }
   0x7   :  { %441 = vmatmul.mubr.msk.bf16.vlgmr.msra.gmra.mxu1 %vm165_vm0, %v27_v10  ;;  %97 = vmatpush1.bf16.msra.mxu0 %v497_v8 }
   0x8   :  { %220 = vmatprep.mubr.bf16.mxu1 %v568_v2 }
   0x9   :  { %9 = vsyncpa [#allocation3], 0  ;;  %v28_v15 = vpack.c.bf16 %v22_v14, %v21_v13  ;;  %v35_v16 = vld [vmem:[%s698_s1 + $0x10] sm:$0xff]  ;;  %v36_v17 = vld [vmem:[%s698_s1 + $0x18] sm:$0xff]  ;;  %v253_v31 = vlaneseq }
   0xa   :  { %435 = vmatmul.mubr.msk.bf16.vlgmr.msra.gmra.mxu0 %vm69_vm1, %v41_v12  ;;  %v42_v18 = vpack.c.bf16 %v36_v17, %v35_v16  ;;  %v23_v19 = vld [vmem:[%s697_s0 + $0x20] sm:$0xff]  ;;  %v24_v20 = vld [vmem:[%s697_s0 + $0x28] sm:$0xff]  ;;  %v25_v25 = vld [vmem:[%s697_s0 + $0x30] sm:$0xff] }
   0xb   :  { %124 = vmatprep.mubr.bf16.mxu0 %v568_v2  ;;  %v29_v21 = vpack.c.bf16 %v24_v20, %v23_v19  ;;  %v37_v22 = vld [vmem:[%s698_s1 + $0x20] sm:$0xff]  ;;  %v38_v23 = vld [vmem:[%s698_s1 + $0x28] sm:$0xff]  ;;  %v26_v26 = vld [vmem:[%s697_s0 + $0x38] sm:$0xff]  ;;  %v254_v32 = vshrl.u32 %v253_v31, 7 }
   0xc   :  { %v43_v24 = vpack.c.bf16 %v38_v23, %v37_v22  ;;  %v30_v27 = vpack.c.bf16 %v26_v26, %v25_v25  ;;  %v39_v28 = vld [vmem:[%s698_s1 + $0x30] sm:$0xff]  ;;  %v40_v29 = vld [vmem:[%s698_s1 + $0x38] sm:$0xff]  ;;  %v251_v35 = vld [vmem:[%s700_s3] sm:$0x3]  ;;  %s569_s1 = smov [#allocation2]  }
   0xd   :  { %v44_v30 = vpack.c.bf16 %v40_v29, %v39_v28  ;;  %v255_v33 = vsub.s32 0, %v254_v32  ;;  %v259_v36 = vsub.s32 1, %v254_v32  ;;  %s420_s3 = sshll.u32 %s569_s1, 4  ;;  %s421_s3 = int_to_ptr.vmem [resolvable:$true] %s420_s3 }
   0xe   :  { %s546_s7 = scalar_lea.vmem %s421_s3, 1024  ;;  %p551_p1 = scmp.lt.s32.totalorder %s421_s3, %s421_s3 }
   0xf   :  { %442 = vmatmul.mubr.msk.bf16.gmra.mxu1 %vm165_vm0, %v28_v15  ;;  %v674_v38 = vrot.slane %v251_v35, %v255_v33  ;;  %v676_v42 = vrot.slane %v251_v35, %v259_v36  ;;  %p547_p0 = scmp.ne.s32.totalorder %s421_s3, %s546_s7  ;;  %p552_p2 = scmp.lt.s32.totalorder %s546_s7, %s546_s7 }
  0x10   :  { %230 = vmatprep.mubr.bf16.mxu1 %v568_v2 }
  0x11   :  { %p553_p3 = por %p552_p2, %p551_p1 }
  0x12   :  { %436 = vmatmul.mubr.msk.bf16.gmra.mxu0 %vm69_vm1, %v42_v18 }
  0x13   :  { %134 = vmatprep.mubr.bf16.mxu0 %v568_v2  ;;  %p554_p4 = pnand %p553_p3, %p547_p0 }
  0x17   :  { %443 = vmatmul.mubr.msk.bf16.gmra.mxu1 %vm165_vm0, %v29_v21 }
  0x18   :  { %240 = vmatprep.mubr.bf16.mxu1 %v568_v2 }
  0x1a   :  { %437 = vmatmul.mubr.msk.bf16.gmra.mxu0 %vm69_vm1, %v43_v24 }
  0x1b   :  { %144 = vmatprep.mubr.bf16.mxu0 %v568_v2 }
  0x1f   :  { %444 = vmatmul.mubr.msk.bf16.gmra.mxu1 %vm165_vm0, %v30_v27 }
  0x22   :  { %438 = vmatmul.mubr.msk.bf16.gmra.mxu0 %vm69_vm1, %v44_v30 }
  0xc7   :  { %v212_v34 = vpop.f32.mrf.mxu1 }
  0xc9   :  { %v214_v37 = vpop.f32.mrf.mxu1 }
  0xca   :  { %v116_v39 = vpop.f32.mrf.mxu0 }
  0xcb   :  { %v216_v40 = vpop.f32.mrf.mxu1  ;;  %v213_v41 = vadd.f32 %v212_v34, %v116_v39 }
  0xcc   :  { %v118_v43 = vpop.f32.mrf.mxu0 }
  0xcd   :  { %v218_v44 = vpop.f32.mrf.mxu1  ;;  %v263_v45 = vadd.f32 %v674_v38, %v213_v41  ;;  %v215_v46 = vadd.f32 %v214_v37, %v118_v43 }
  0xce   :  { %v120_v47 = vpop.f32.mrf.mxu0 }
  0xcf   :  { %v222_v48 = vpop.f32.mrf.mxu1  ;;  %v445_v49 = vmul.f32 -1.442695, %v263_v45  ;;  %v264_v50 = vadd.f32 %v676_v42, %v215_v46  ;;  %v217_v51 = vadd.f32 %v216_v40, %v120_v47 }
  0xd0   :  { %v122_v52 = vpop.f32.mrf.mxu0 }
  0xd1   :  { %v224_v53 = vpop.f32.mrf.mxu1  ;;  %498 = vpow2.f32 %v445_v49  ;;  %v265_v54 = vadd.f32 %v674_v38, %v217_v51  ;;  %v219_v55 = vadd.f32 %v218_v44, %v122_v52 }
  0xd2   :  { %500 = vtanh.f32 %v264_v50  ;;  %v126_v56 = vpop.f32.mrf.mxu0 }
  0xd3   :  { %v226_v57 = vpop.f32.mrf.mxu1  ;;  %v446_v58 = vmul.f32 -1.442695, %v265_v54  ;;  %v266_v59 = vadd.f32 %v676_v42, %v219_v55  ;;  %v223_v60 = vadd.f32 %v222_v48, %v126_v56 }
  0xd4   :  { %v128_v61 = vpop.f32.mrf.mxu0 }
  0xd5   :  { %v228_v62 = vpop.f32.mrf.mxu1  ;;  %502 = vpow2.f32 %v446_v58  ;;  %v267_v63 = vadd.f32 %v674_v38, %v223_v60  ;;  %v225_v0 = vadd.f32 %v224_v53, %v128_v61 }
  0xd6   :  { %504 = vtanh.f32 %v266_v59  ;;  %v130_v1 = vpop.f32.mrf.mxu0 }
  0xd7   :  { %v232_v2 = vpop.f32.mrf.mxu1  ;;  %v447_v3 = vmul.f32 -1.442695, %v267_v63  ;;  %v268_v4 = vadd.f32 %v676_v42, %v225_v0  ;;  %v227_v5 = vadd.f32 %v226_v57, %v130_v1 }
  0xd8   :  { %v132_v6 = vpop.f32.mrf.mxu0 }
  0xd9   :  { %v234_v7 = vpop.f32.mrf.mxu1  ;;  %506 = vpow2.f32 %v447_v3  ;;  %v269_v8 = vadd.f32 %v674_v38, %v227_v5  ;;  %v229_v9 = vadd.f32 %v228_v62, %v132_v6 }
  0xda   :  { %508 = vtanh.f32 %v268_v4  ;;  %v136_v10 = vpop.f32.mrf.mxu0 }
  0xdb   :  { %v236_v11 = vpop.f32.mrf.mxu1  ;;  %v448_v12 = vmul.f32 -1.442695, %v269_v8  ;;  %v270_v13 = vadd.f32 %v676_v42, %v229_v9  ;;  %v233_v14 = vadd.f32 %v232_v2, %v136_v10 }
  0xdc   :  { %v138_v15 = vpop.f32.mrf.mxu0 }
  0xdd   :  { %v238_v16 = vpop.f32.mrf.mxu1  ;;  %510 = vpow2.f32 %v448_v12  ;;  %v271_v17 = vadd.f32 %v674_v38, %v233_v14  ;;  %v235_v18 = vadd.f32 %v234_v7, %v138_v15 }
  0xde   :  { %v499_v19 = vpop.eup %498  ;;  %512 = vtanh.f32 %v270_v13  ;;  %v140_v20 = vpop.f32.mrf.mxu0 }
  0xdf   :  { %v242_v21 = vpop.f32.mrf.mxu1  ;;  %v501_v22 = vpop.eup %500  ;;  %v303_v23 = vadd.f32 1.0, %v499_v19  ;;  %v449_v24 = vmul.f32 -1.442695, %v271_v17  ;;  %v272_v25 = vadd.f32 %v676_v42, %v235_v18  ;;  %v237_v26 = vadd.f32 %v236_v11, %v140_v20 }
  0xe0   :  { %v477_v27 = vpack.c.bf16 %v501_v22, %v501_v22  ;;  %v142_v28 = vpop.f32.mrf.mxu0 }
  0xe1   :  { %v244_v29 = vpop.f32.mrf.mxu1  ;;  %514 = vrcp.f32 %v303_v23  ;;  %v273_v30 = vadd.f32 %v674_v38, %v237_v26  ;;  %v239_v31 = vadd.f32 %v238_v16, %v142_v28 }
  0xe2   :  { %v503_v32 = vpop.eup %502  ;;  %407 = vst [vmem:[#allocation2 + $0x4] sm:$0xf] %v477_v27  ;;  %516 = vpow2.f32 %v449_v24  ;;  %v146_v33 = vpop.f32.mrf.mxu0 }
  0xe3   :  { %v505_v34 = vpop.eup %504  ;;  %v304_v35 = vadd.f32 1.0, %v503_v32  ;;  %518 = vtanh.f32 %v272_v25  ;;  %v450_v36 = vmul.f32 -1.442695, %v273_v30  ;;  %v274_v37 = vadd.f32 %v676_v42, %v239_v31  ;;  %v246_v41 = vpop.f32.mrf.mxu1 }
  0xe4   :  { %v478_v39 = vpack.c.bf16 %v505_v34, %v505_v34  ;;  %v243_v40 = vadd.f32 %v242_v21, %v146_v33  ;;  %v148_v43 = vpop.f32.mrf.mxu0 }
  0xe5   :  { %520 = vrcp.f32 %v304_v35  ;;  %v245_v44 = vadd.f32 %v244_v29, %v148_v43  ;;  %v248_v54 = vpop.f32.mrf.mxu1 }
  0xe6   :  { %v507_v45 = vpop.eup %506  ;;  %408 = vst [vmem:[#allocation2 + $0xc] sm:$0xf] %v478_v39  ;;  %522 = vpow2.f32 %v450_v36  ;;  %v275_v46 = vadd.f32 %v674_v38, %v243_v40  ;;  %v150_v47 = vpop.f32.mrf.mxu0 }
  0xe7   :  { %v509_v48 = vpop.eup %508  ;;  %v305_v49 = vadd.f32 1.0, %v507_v45  ;;  %524 = vtanh.f32 %v274_v37  ;;  %v276_v50 = vadd.f32 %v676_v42, %v245_v44  ;;  %v247_v51 = vadd.f32 %v246_v41, %v150_v47 }
  0xe8   :  { %v479_v52 = vpack.c.bf16 %v509_v48, %v509_v48  ;;  %v451_v53 = vmul.f32 -1.442695, %v275_v46  ;;  %v152_v55 = vpop.f32.mrf.mxu0 }
  0xe9   :  { %526 = vrcp.f32 %v305_v49  ;;  %v277_v56 = vadd.f32 %v674_v38, %v247_v51  ;;  %v249_v57 = vadd.f32 %v248_v54, %v152_v55 }
  0xea   :  { %v511_v58 = vpop.eup %510  ;;  %409 = vst [vmem:[#allocation2 + $0x14] sm:$0xf] %v479_v52  ;;  %528 = vpow2.f32 %v451_v53 }
  0xeb   :  { %v513_v59 = vpop.eup %512  ;;  %v306_v60 = vadd.f32 1.0, %v511_v58  ;;  %530 = vtanh.f32 %v276_v50  ;;  %v452_v61 = vmul.f32 -1.442695, %v277_v56  ;;  %v278_v62 = vadd.f32 %v676_v42, %v249_v57 }
  0xec   :  { %v480_v63 = vpack.c.bf16 %v513_v59, %v513_v59 }
  0xed   :  { %532 = vrcp.f32 %v306_v60 }
  0xee   :  { %v515_v0 = vpop.eup %514  ;;  %410 = vst [vmem:[#allocation2 + $0x1c] sm:$0xf] %v480_v63  ;;  %534 = vpow2.f32 %v452_v61 }
  0xef   :  { %v517_v1 = vpop.eup %516  ;;  %v469_v2 = vpack.c.bf16 %v515_v0, %v515_v0  ;;  %536 = vtanh.f32 %v278_v62 }
  0xf0   :  { %v519_v3 = vpop.eup %518  ;;  %v307_v38 = vadd.f32 1.0, %v517_v1 }
  0xf1   :  { %359 = vst [vmem:[#allocation2] sm:$0xf] %v469_v2  ;;  %v481_v4 = vpack.c.bf16 %v519_v3, %v519_v3 }
  0xf2   :  { %v521_v5 = vpop.eup %520  ;;  %538 = vrcp.f32 %v307_v38 }
  0xf3   :  { %v523_v6 = vpop.eup %522  ;;  %v470_v7 = vpack.c.bf16 %v521_v5, %v521_v5  ;;  %411 = vst [vmem:[#allocation2 + $0x24] sm:$0xf] %v481_v4 }
  0xf4   :  { %v525_v8 = vpop.eup %524  ;;  %v308_v9 = vadd.f32 1.0, %v523_v6 }
  0xf5   :  { %360 = vst [vmem:[#allocation2 + $0x8] sm:$0xf] %v470_v7  ;;  %v482_v42 = vpack.c.bf16 %v525_v8, %v525_v8 }
  0xf6   :  { %v527_v10 = vpop.eup %526  ;;  %540 = vrcp.f32 %v308_v9 }
  0xf7   :  { %v529_v11 = vpop.eup %528  ;;  %v471_v12 = vpack.c.bf16 %v527_v10, %v527_v10  ;;  %412 = vst [vmem:[#allocation2 + $0x2c] sm:$0xf] %v482_v42 }
  0xf8   :  { %v531_v13 = vpop.eup %530  ;;  %v309_v14 = vadd.f32 1.0, %v529_v11 }
  0xf9   :  { %361 = vst [vmem:[#allocation2 + $0x10] sm:$0xf] %v471_v12  ;;  %v483_v15 = vpack.c.bf16 %v531_v13, %v531_v13 }
  0xfa   :  { %v533_v16 = vpop.eup %532  ;;  %542 = vrcp.f32 %v309_v14 }
  0xfb   :  { %v535_v17 = vpop.eup %534  ;;  %v472_v18 = vpack.c.bf16 %v533_v16, %v533_v16  ;;  %413 = vst [vmem:[#allocation2 + $0x34] sm:$0xf] %v483_v15 }
  0xfc   :  { %v537_v19 = vpop.eup %536  ;;  %v310_v20 = vadd.f32 1.0, %v535_v17 }
  0xfd   :  { %362 = vst [vmem:[#allocation2 + $0x18] sm:$0xf] %v472_v18  ;;  %v484_v21 = vpack.c.bf16 %v537_v19, %v537_v19 }
  0xfe   :  { %544 = vrcp.f32 %v310_v20 }
  0xff   :  { %v539_v22 = vpop.eup %538  ;;  %414 = vst [vmem:[#allocation2 + $0x3c] sm:$0xf] %v484_v21 }
 0x100   :  { %v473_v23 = vpack.c.bf16 %v539_v22, %v539_v22 }
 0x102   :  { %363 = vst [vmem:[#allocation2 + $0x20] sm:$0xf] %v473_v23 }
 0x103   :  { %v541_v24 = vpop.eup %540 }
 0x104   :  { %v474_v25 = vpack.c.bf16 %v541_v24, %v541_v24 }
 0x106   :  { %364 = vst [vmem:[#allocation2 + $0x28] sm:$0xf] %v474_v25 }
 0x107   :  { %v543_v26 = vpop.eup %542 }
 0x108   :  { %v475_v27 = vpack.c.bf16 %v543_v26, %v543_v26 }
 0x10a   :  { %365 = vst [vmem:[#allocation2 + $0x30] sm:$0xf] %v475_v27 }
 0x10b   :  { %v545_v28 = vpop.eup %544 }
 0x10c   :  { %v476_v29 = vpack.c.bf16 %v545_v28, %v545_v28 }
 0x10e   :  { %366 = vst [vmem:[#allocation2 + $0x38] sm:$0xf] %v476_v29 }
 0x10f   :  { %557 = shalt.err (!%p554_p4)
}
 0x110   :  { %s570_s8 = smov 128   ;;  %s571_s9 = smov 8  }
 0x111   :  { %426 = dma.vmem_to_hbm [thread:$0]  %s421_s3, 1024, %s701_s4, [#allocation3], %s570_s8, %s570_s8, %s571_s9  }
 0x112   :  { %566 = dma.done.wait [#allocation3], 1024  }
 0x113   :  { %567 = vsyncadd [#allocation3], 4294966272 }
 0x114   :  { %430 = vsyncpa [#allocation3], 1 }

</bundles_post_ra>
